<compile_context>
chip_gen: v5e
topology: v5e:2x2
jax: 0.10.0
libtpu: 0.0.40
codegen_flags: <defaults>
</compile_context>

<pallas_src>
import functools

import jax
import jax.numpy as jnp
from jax.experimental import pallas as pl
from jax.experimental.pallas import tpu as pltpu


def _softplus(x, threshold=20.0):
    # torch.nn.Softplus(beta=1, threshold=20), specialized for beta == 1:
    #   softplus(x) = log(1 + exp(x))  if x <= threshold else x
    return jnp.where(x > threshold, x, jnp.log1p(jnp.exp(jnp.minimum(x, threshold))))


def _round_up(x, m):
    return ((x + m - 1) // m) * m


def _cdiv(a, b):
    return -(-a // b)


def _edge_mlp_kernel(num_linears, compute_dtype, *refs):
    """One feature-major edge tile.

    refs = (xT, batchT, uw, w0_sda, w1, b1, ..., w_{L-1}, b_{L-1}, outT)

    xT      [s+d+a, TILE_E]  streamed slab of concat(src, dst, edge_attr).T
    batchT  [1, TILE_E]      int32 graph ids
    uw      [hidden, G]      precomputed  W0_u @ u.T + b0  (f32, VMEM-resident)
    w0_sda  [hidden, s+d+a]  first-layer weight for the streamed slab
    Activations stay [features, TILE_E]: the large edge axis lies on the lane
    axis, so elementwise/EUP work is lane-dense and output stores are unmasked.
    """
    xT_ref, batchT_ref, uw_ref, w0_ref = refs[:4]
    layer_refs = refs[4:-1]
    out_ref = refs[-1]

    tile_e = xT_ref.shape[-1]
    num_graphs = uw_ref.shape[-1]

    # ---- fused u[batch] gather + first-layer u contribution + bias:
    # each onehot column has exactly one 1, so uw @ onehot = (W0_u @ u[batch].T + b0).
    batch_ids = batchT_ref[...]                                          # [1, TILE_E] i32
    graph_ids = jax.lax.broadcasted_iota(jnp.int32, (num_graphs, tile_e), 0)
    onehot = (graph_ids == batch_ids).astype(jnp.float32)                # [G, TILE_E]
    h = jnp.dot(uw_ref[...], onehot,
                preferred_element_type=jnp.float32)                      # [hid, TILE_E] f32

    # ---- first Linear on the merged src|dst|edge_attr slab (ONE matmul).
    h = h + jnp.dot(w0_ref[...], xT_ref[...],
                    preferred_element_type=jnp.float32)
    if num_linears > 1:
        h = _softplus(h)                                                 # f32 (v5e-safe)

    # ---- remaining Linear (+ Softplus) layers, weights VMEM-resident.
    for li in range(num_linears - 1):
        w = layer_refs[2 * li][...]
        b = layer_refs[2 * li + 1][...]
        h = jnp.dot(w, h.astype(compute_dtype),
                    preferred_element_type=jnp.float32) + b
        if li < num_linears - 2:
            h = _softplus(h)

    out_ref[...] = h.astype(out_ref.dtype)


def edge_model_forward(src, dst, edge_attr, u, batch, weights, biases, *,
                       tile_e=8192, compute_dtype=jnp.float32, out_dtype=None,
                       feature_major_out=False):
    """EdgeModel forward (concat + u[batch] gather fused into the Pallas MLP kernel).

    src, dst:   [E, node_feat]      edge_attr: [E, edge_feat]
    u:          [G, u_feat]         batch:     [E] int graph ids in [0, G)
    weights:    list of [in, out] f32 (transposed vs. PyTorch Linear's [out, in])
    biases:     list of [out] f32
    compute_dtype: jnp.float32 or jnp.bfloat16 (bf16 recommended on v5e/v6e/v7x:
                   halves streamed bytes; accumulation/softplus stay f32).
    feature_major_out: return [out_dim, E] (skips the final transpose — keep
                   feature-major end-to-end in a real graph-net pipeline).

    NOTE: ids >= G contribute zeros (and drop the bias) instead of raising like
    PyTorch indexing would; callers should validate `batch` upstream.
    """
    compute_dtype = jnp.dtype(compute_dtype)
    out_dtype = jnp.dtype(out_dtype) if out_dtype is not None else src.dtype
    E = src.shape[0]
    s_dim, d_dim, a_dim = src.shape[1], dst.shape[1], edge_attr.shape[1]
    sda = s_dim + d_dim + a_dim
    num_graphs, u_dim = u.shape
    num_linears = len(weights)
    out_dim = weights[-1].shape[1]
    assert weights[0].shape[0] == sda + u_dim

    # ---- edge-axis tiling: lane axis multiple of 128; pad the ragged tail in
    # the wrapper (padded rows are computed then sliced off, never read back).
    tile = min(tile_e, _round_up(max(E, 1), 128))
    if E > 128:
        # Prefer >= 2 tiles per call so both v7x TensorCores get work.
        tile = min(tile, _round_up(_cdiv(E, 2), 128))
    e_pad = _round_up(max(E, 1), tile)

    # ---- one pad+concat+transpose+cast pass for the streamed slab.
    x = jnp.concatenate([src, dst, edge_attr], axis=1)                      # [E, sda]
    xT = jnp.pad(x, ((0, e_pad - E), (0, 0))).T.astype(compute_dtype)       # [sda, e_pad]
    batchT = jnp.pad(batch.astype(jnp.int32), (0, e_pad - E)).reshape(1, e_pad)

    # ---- hoisted u-path: uw[:, g] = W0_u @ u[g] + b0  ([hidden, G], f32).
    w0 = weights[0]
    w0_sda = w0[:sda].T.astype(compute_dtype)                               # [hid, sda]
    w0_u = w0[sda:].astype(jnp.float32)                                     # [u_dim, hid]
    uw = (jnp.dot(u.astype(jnp.float32), w0_u).T
          + biases[0].reshape(-1, 1).astype(jnp.float32))                   # [hid, G] f32

    operands = [xT, batchT, uw, w0_sda]
    in_specs = [
        pl.BlockSpec((sda, tile), lambda i: (0, i)),   # streamed per edge tile
        pl.BlockSpec((1, tile), lambda i: (0, i)),
        pl.BlockSpec(uw.shape, lambda i: (0, 0)),      # small params: VMEM-resident
        pl.BlockSpec(w0_sda.shape, lambda i: (0, 0)),
    ]
    for w, b in zip(weights[1:], biases[1:]):
        wk = w.T.astype(compute_dtype)
        bk = b.reshape(-1, 1).astype(jnp.float32)
        operands += [wk, bk]
        in_specs += [pl.BlockSpec(wk.shape, lambda i: (0, 0)),
                     pl.BlockSpec(bk.shape, lambda i: (0, 0))]

    grid = (e_pad // tile,)

    # Double-buffered streams at tile=8192 in f32 are ~(sda+1+out)*8192*4*2 ≈ 2.4 MiB
    # plus a few KiB of resident weights; 32 MiB scoped VMEM is safe on v5e/v6e/v7x.
    vmem_limit_bytes = 32 * 1024 * 1024

    kernel = functools.partial(_edge_mlp_kernel, num_linears, compute_dtype)

    outT = pl.pallas_call(
        kernel,
        out_shape=jax.ShapeDtypeStruct((out_dim, e_pad), out_dtype),
        grid_spec=pltpu.PrefetchScalarGridSpec(
            num_scalar_prefetch=0,
            grid=grid,
            in_specs=in_specs,
            out_specs=pl.BlockSpec((out_dim, tile), lambda i: (0, i)),
        ),
        compiler_params=pltpu.CompilerParams(
            dimension_semantics=("parallel",),  # independent edge tiles -> both TCs on v7x
            vmem_limit_bytes=vmem_limit_bytes,
        ),
    )(*operands)

    if feature_major_out:
        return outT[:, :E]
    return outT[:, :E].T   # back to [E, out_dim] row-major (module semantics)


def edge_model_reference(src, dst, edge_attr, u, batch, weights, biases):
    """Pure-JAX reference (HIGHEST precision) for correctness checking."""
    x = jnp.concatenate([src, dst, edge_attr, jnp.take(u, batch, axis=0)], axis=1)
    h = x
    for li, (w, b) in enumerate(zip(weights, biases)):
        h = jnp.dot(h, w, precision=jax.lax.Precision.HIGHEST) + b
        if li < len(weights) - 1:
            h = _softplus(h)
    return h


def init_edge_mlp_params(key, node_emb_size, edge_emb_size, hidden_emb_size, fe_layers):
    """Deterministic init matching the module's layer shapes.

    fe_features = [node_emb_size] + [hidden]*fe_layers + [edge_emb_size]
    -> fe_layers linears with Softplus in between, plus a final linear.
    Weights stored [in, out] (transpose of PyTorch's [out, in]).
    """
    fe_features = [node_emb_size] + [hidden_emb_size] * fe_layers + [edge_emb_size]
    weights, biases = [], []
    for i in range(len(fe_features) - 1):
        fan_in, fan_out = fe_features[i], fe_features[i + 1]
        key, kw, kb = jax.random.split(key, 3)
        bound = 1.0 / jnp.sqrt(fan_in)
        w = jax.random.uniform(kw, (fan_in, fan_out), jnp.float32, -bound, bound)
        b = jax.random.uniform(kb, (fan_out,), jnp.float32, -bound, bound)
        weights.append(w)
        biases.append(b)
    return weights, biases


if __name__ == "__main__":
    # Small, module-consistent shapes.
    num_edges = 16
    num_graphs = 2
    src_dim = 8
    edge_attr_dim = 4
    u_dim = 12
    node_emb_size = src_dim + src_dim + edge_attr_dim + u_dim  # 32 = MLP input width
    edge_emb_size = 16
    hidden_emb_size = 32
    fe_layers = 2

    key = jax.random.PRNGKey(0)
    k_src, k_dst, k_edge, k_u, k_batch, k_params = jax.random.split(key, 6)

    src = jax.random.normal(k_src, (num_edges, src_dim), jnp.float32)
    dst = jax.random.normal(k_dst, (num_edges, src_dim), jnp.float32)
    edge_attr = jax.random.normal(k_edge, (num_edges, edge_attr_dim), jnp.float32)
    u = jax.random.normal(k_u, (num_graphs, u_dim), jnp.float32)
    batch = jax.random.randint(k_batch, (num_edges,), 0, num_graphs, jnp.int32)

    weights, biases = init_edge_mlp_params(
        k_params, node_emb_size, edge_emb_size, hidden_emb_size, fe_layers)

    ref = edge_model_reference(src, dst, edge_attr, u, batch, weights, biases)

    # 1) f32-streamed path (default MXU precision, per perf review), single tile.
    #    Tolerance accounts for default-precision (bf16-pass) MXU matmuls vs the
    #    HIGHEST-precision reference; real bugs produce O(1) errors.
    out = jax.block_until_ready(
        edge_model_forward(src, dst, edge_attr, u, batch, weights, biases))
    assert out.shape == (num_edges, edge_emb_size), out.shape
    assert jnp.allclose(out, ref, atol=5e-2, rtol=5e-2), \
        float(jnp.max(jnp.abs(out - ref)))

    # 2) Multi-tile grid with a ragged tail (E=300, tile=128 -> grid of 3, padded to 384).
    E2 = 300
    k2 = jax.random.split(jax.random.PRNGKey(1), 5)
    src2 = jax.random.normal(k2[0], (E2, src_dim), jnp.float32)
    dst2 = jax.random.normal(k2[1], (E2, src_dim), jnp.float32)
    ea2 = jax.random.normal(k2[2], (E2, edge_attr_dim), jnp.float32)
    u2 = jax.random.normal(k2[3], (num_graphs, u_dim), jnp.float32)
    batch2 = jax.random.randint(k2[4], (E2,), 0, num_graphs, jnp.int32)
    out2 = jax.block_until_ready(
        edge_model_forward(src2, dst2, ea2, u2, batch2, weights, biases, tile_e=128))
    ref2 = edge_model_reference(src2, dst2, ea2, u2, batch2, weights, biases)
    assert out2.shape == (E2, edge_emb_size), out2.shape
    assert jnp.allclose(out2, ref2, atol=5e-2, rtol=5e-2), \
        float(jnp.max(jnp.abs(out2 - ref2)))

    # 3) bf16-streamed variant (recommended on v5e/v6e/v7x; f32 accumulation +
    #    f32 softplus keep it valid on v5e's f32-only VPU/EUP).
    out_bf16 = jax.block_until_ready(
        edge_model_forward(src, dst, edge_attr, u, batch, weights, biases,
                           compute_dtype=jnp.bfloat16))
    assert out_bf16.shape == (num_edges, edge_emb_size)
    assert jnp.allclose(out_bf16, ref, atol=1.5e-1, rtol=1.5e-1), \
        float(jnp.max(jnp.abs(out_bf16 - ref)))

    # 4) Feature-major output path (no wrapper-side transpose round trip).
    out_fm = jax.block_until_ready(
        edge_model_forward(src, dst, edge_attr, u, batch, weights, biases,
                           feature_major_out=True))
    assert out_fm.shape == (edge_emb_size, num_edges)
    assert jnp.allclose(out_fm.T, ref, atol=5e-2, rtol=5e-2)

    print("KERNEL_OK")
</pallas_src>

<mosaic_0001>
module attributes {stable_mosaic.version = 11 : i64} {
  func.func @_edge_mlp_kernel(%arg0: i32, %arg1: memref<20x128xf32, #tpu.memory_space<vmem>>, %arg2: memref<1x128xi32, #tpu.memory_space<vmem>>, %arg3: memref<32x2xf32, #tpu.memory_space<vmem>>, %arg4: memref<32x20xf32, #tpu.memory_space<vmem>>, %arg5: memref<32x32xf32, #tpu.memory_space<vmem>>, %arg6: memref<32x1xf32, #tpu.memory_space<vmem>>, %arg7: memref<16x32xf32, #tpu.memory_space<vmem>>, %arg8: memref<16x1xf32, #tpu.memory_space<vmem>>, %arg9: memref<16x128xf32, #tpu.memory_space<vmem>>) attributes {dimension_semantics = [#tpu.dimension_semantics<parallel>], iteration_bounds = array<i64: 1>, scalar_prefetch = 0 : i64, scratch_operands = 0 : i64, tpu.core_type = #tpu.core_type<tc>, window_params = [{transform_indices = @transform_0, window_bounds = array<i64: 20, 128>}, {transform_indices = @transform_1, window_bounds = array<i64: 1, 128>}, {pipeline_mode = #tpu.pipeline_mode<synchronous>, transform_indices = @transform_2, window_bounds = array<i64: 32, 2>}, {pipeline_mode = #tpu.pipeline_mode<synchronous>, transform_indices = @transform_3, window_bounds = array<i64: 32, 20>}, {pipeline_mode = #tpu.pipeline_mode<synchronous>, transform_indices = @transform_4, window_bounds = array<i64: 32, 32>}, {pipeline_mode = #tpu.pipeline_mode<synchronous>, transform_indices = @transform_5, window_bounds = array<i64: 32, 1>}, {pipeline_mode = #tpu.pipeline_mode<synchronous>, transform_indices = @transform_6, window_bounds = array<i64: 16, 32>}, {pipeline_mode = #tpu.pipeline_mode<synchronous>, transform_indices = @transform_7, window_bounds = array<i64: 16, 1>}, {transform_indices = @transform_8, window_bounds = array<i64: 16, 128>}]} {
    %c0 = arith.constant 0 : index
    %c0_0 = arith.constant 0 : index
    %0 = vector.load %arg2[%c0, %c0_0] : memref<1x128xi32, #tpu.memory_space<vmem>>, vector<1x128xi32>
    %1 = tpu.iota {dimensions = array<i32: 0>} : vector<2x128xi32>
    %2 = vector.broadcast %0 : vector<1x128xi32> to vector<2x128xi32>
    %3 = arith.cmpi eq, %1, %2 : vector<2x128xi32>
    %4 = arith.extui %3 : vector<2x128xi1> to vector<2x128xi32>
    %5 = arith.sitofp %4 : vector<2x128xi32> to vector<2x128xf32>
    %c0_1 = arith.constant 0 : index
    %c0_2 = arith.constant 0 : index
    %6 = vector.load %arg3[%c0_1, %c0_2] : memref<32x2xf32, #tpu.memory_space<vmem>>, vector<32x2xf32>
    %cst = arith.constant dense<0.000000e+00> : vector<32x128xf32>
    %7 = tpu.matmul %6, %5, %cst {dimension_numbers = #tpu.dot_dimension_numbers<[1], [0], [0], [1], [0, 0, 1, 1], [], []>} : vector<32x2xf32>, vector<2x128xf32>, vector<32x128xf32> -> vector<32x128xf32>
    %c0_3 = arith.constant 0 : index
    %c0_4 = arith.constant 0 : index
    %8 = vector.load %arg4[%c0_3, %c0_4] : memref<32x20xf32, #tpu.memory_space<vmem>>, vector<32x20xf32>
    %c0_5 = arith.constant 0 : index
    %c0_6 = arith.constant 0 : index
    %9 = vector.load %arg1[%c0_5, %c0_6] : memref<20x128xf32, #tpu.memory_space<vmem>>, vector<20x128xf32>
    %cst_7 = arith.constant dense<0.000000e+00> : vector<32x128xf32>
    %10 = tpu.matmul %8, %9, %cst_7 {dimension_numbers = #tpu.dot_dimension_numbers<[1], [0], [0], [1], [0, 0, 1, 1], [], []>} : vector<32x20xf32>, vector<20x128xf32>, vector<32x128xf32> -> vector<32x128xf32>
    %11 = arith.addf %7, %10 : vector<32x128xf32>
    %cst_8 = arith.constant 2.000000e+01 : f32
    %12 = vector.broadcast %cst_8 : f32 to vector<32x128xf32>
    %13 = arith.cmpf ogt, %11, %12 : vector<32x128xf32>
    %cst_9 = arith.constant 2.000000e+01 : f32
    %14 = vector.broadcast %cst_9 : f32 to vector<32x128xf32>
    %15 = arith.minimumf %11, %14 : vector<32x128xf32>
    %16 = math.exp %15 : vector<32x128xf32>
    %17 = math.log1p %16 : vector<32x128xf32>
    %18 = arith.select %13, %11, %17 : vector<32x128xi1>, vector<32x128xf32>
    %c0_10 = arith.constant 0 : index
    %c0_11 = arith.constant 0 : index
    %19 = vector.load %arg5[%c0_10, %c0_11] : memref<32x32xf32, #tpu.memory_space<vmem>>, vector<32x32xf32>
    %c0_12 = arith.constant 0 : index
    %c0_13 = arith.constant 0 : index
    %20 = vector.load %arg6[%c0_12, %c0_13] : memref<32x1xf32, #tpu.memory_space<vmem>>, vector<32x1xf32>
    %cst_14 = arith.constant dense<0.000000e+00> : vector<32x128xf32>
    %21 = tpu.matmul %19, %18, %cst_14 {dimension_numbers = #tpu.dot_dimension_numbers<[1], [0], [0], [1], [0, 0, 1, 1], [], []>} : vector<32x32xf32>, vector<32x128xf32>, vector<32x128xf32> -> vector<32x128xf32>
    %22 = vector.broadcast %20 : vector<32x1xf32> to vector<32x128xf32>
    %23 = arith.addf %21, %22 : vector<32x128xf32>
    %cst_15 = arith.constant 2.000000e+01 : f32
    %24 = vector.broadcast %cst_15 : f32 to vector<32x128xf32>
    %25 = arith.cmpf ogt, %23, %24 : vector<32x128xf32>
    %cst_16 = arith.constant 2.000000e+01 : f32
    %26 = vector.broadcast %cst_16 : f32 to vector<32x128xf32>
    %27 = arith.minimumf %23, %26 : vector<32x128xf32>
    %28 = math.exp %27 : vector<32x128xf32>
    %29 = math.log1p %28 : vector<32x128xf32>
    %30 = arith.select %25, %23, %29 : vector<32x128xi1>, vector<32x128xf32>
    %c0_17 = arith.constant 0 : index
    %c0_18 = arith.constant 0 : index
    %31 = vector.load %arg7[%c0_17, %c0_18] : memref<16x32xf32, #tpu.memory_space<vmem>>, vector<16x32xf32>
    %c0_19 = arith.constant 0 : index
    %c0_20 = arith.constant 0 : index
    %32 = vector.load %arg8[%c0_19, %c0_20] : memref<16x1xf32, #tpu.memory_space<vmem>>, vector<16x1xf32>
    %cst_21 = arith.constant dense<0.000000e+00> : vector<16x128xf32>
    %33 = tpu.matmul %31, %30, %cst_21 {dimension_numbers = #tpu.dot_dimension_numbers<[1], [0], [0], [1], [0, 0, 1, 1], [], []>} : vector<16x32xf32>, vector<32x128xf32>, vector<16x128xf32> -> vector<16x128xf32>
    %34 = vector.broadcast %32 : vector<16x1xf32> to vector<16x128xf32>
    %35 = arith.addf %33, %34 : vector<16x128xf32>
    %c0_22 = arith.constant 0 : index
    %c0_23 = arith.constant 0 : index
    %36 = vector.load %arg9[%c0_22, %c0_23] : memref<16x128xf32, #tpu.memory_space<vmem>>, vector<16x128xf32>
    tpu.vector_store %arg9[%c0_22, %c0_23], %35 {strides = array<i32>} : memref<16x128xf32, #tpu.memory_space<vmem>>, vector<16x128xf32>,
    return
  }
  func.func @transform_0(%arg0: i32) -> (i32, i32) {
    %c0_i32 = arith.constant 0 : i32
    %c0_i32_0 = arith.constant 0 : i32
    return %c0_i32, %arg0 : i32, i32
  }
  func.func @transform_1(%arg0: i32) -> (i32, i32) {
    %c0_i32 = arith.constant 0 : i32
    %c0_i32_0 = arith.constant 0 : i32
    return %c0_i32, %arg0 : i32, i32
  }
  func.func @transform_2(%arg0: i32) -> (i32, i32) {
    %c0_i32 = arith.constant 0 : i32
    %c0_i32_0 = arith.constant 0 : i32
    %c0_i32_1 = arith.constant 0 : i32
    return %c0_i32, %c0_i32_0 : i32, i32
  }
  func.func @transform_3(%arg0: i32) -> (i32, i32) {
    %c0_i32 = arith.constant 0 : i32
    %c0_i32_0 = arith.constant 0 : i32
    %c0_i32_1 = arith.constant 0 : i32
    return %c0_i32, %c0_i32_0 : i32, i32
  }
  func.func @transform_4(%arg0: i32) -> (i32, i32) {
    %c0_i32 = arith.constant 0 : i32
    %c0_i32_0 = arith.constant 0 : i32
    %c0_i32_1 = arith.constant 0 : i32
    return %c0_i32, %c0_i32_0 : i32, i32
  }
  func.func @transform_5(%arg0: i32) -> (i32, i32) {
    %c0_i32 = arith.constant 0 : i32
    %c0_i32_0 = arith.constant 0 : i32
    %c0_i32_1 = arith.constant 0 : i32
    return %c0_i32, %c0_i32_0 : i32, i32
  }
  func.func @transform_6(%arg0: i32) -> (i32, i32) {
    %c0_i32 = arith.constant 0 : i32
    %c0_i32_0 = arith.constant 0 : i32
    %c0_i32_1 = arith.constant 0 : i32
    return %c0_i32, %c0_i32_0 : i32, i32
  }
  func.func @transform_7(%arg0: i32) -> (i32, i32) {
    %c0_i32 = arith.constant 0 : i32
    %c0_i32_0 = arith.constant 0 : i32
    %c0_i32_1 = arith.constant 0 : i32
    return %c0_i32, %c0_i32_0 : i32, i32
  }
  func.func @transform_8(%arg0: i32) -> (i32, i32) {
    %c0_i32 = arith.constant 0 : i32
    %c0_i32_0 = arith.constant 0 : i32
    return %c0_i32, %arg0 : i32, i32
  }
}

</mosaic_0001>

<bundles_post_ra>
// kernel: tpu_custom_call.1
= control target key start
LH: loop header
LB: loop body
LE: loop exit
PB: predicated region body
PF: predicated region fallthrough
CT: control target
= control target key end

     0   :  { %vm61_vm0 = vcmask 1043456   ;;  %v31_v2 = vlaneseq  ;;  %vm107_vm1 = vcmask 1041408   ;;  %vm48_vm2 = vcmask 162816   ;;  %s638_s0 = inlined_call_operand.vmem [shape: f32[20,128], index: 0, kind: input, shape index: {}]   ;;  %s639_s1 = inlined_call_operand.vmem [shape: s32[1,128], index: 1, kind: input, shape index: {}]   ;;  %s640_s2 = inlined_call_operand.vmem [shape: f32[32,2], index: 2, kind: input, shape index: {}]   ;;  %s641_s3 = inlined_call_operand.vmem [shape: f32[32,20], index: 3, kind: input, shape index: {}]   ;;  %s642_s4 = inlined_call_operand.vmem [shape: f32[32,32], index: 4, kind: input, shape index: {}]   ;;  %s643_s5 = inlined_call_operand.vmem [shape: f32[32,1], index: 5, kind: input, shape index: {}]   ;;  %s644_s6 = inlined_call_operand.vmem [shape: f32[16,32], index: 6, kind: input, shape index: {}]   ;;  %s645_s7 = inlined_call_operand.vmem [shape: f32[16,1], index: 7, kind: input, shape index: {}]   ;;  %s646_s8 = inlined_call_operand.hbm [shape: f32[16,128], index: 8, kind: output, shape index: {}]  }
   0x1   :  { %v47_v0 = vld [vmem:[%s638_s0 + $0x10] sm:$0xf]  ;;  %v46_v1 = vld [vmem:[%s638_s0 + $0x8] sm:$0xff]  ;;  %v410_v3 = vld [vmem:[%s639_s1] ss:$0 sm:$0xff]  ;;  %vm94_vm4 = vcmask 15360  }
   0x2   :  { %386 = vmatpush.msk.msra.mxu0 %vm61_vm0, %v47_v0  ;;  %v45_v4 = vld [vmem:[%s638_s0] sm:$0xff]  ;;  %v32_v5 = vshrl.u32 %v31_v2, 7 }
   0x3   :  { %v41_v6 = vld [vmem:[%s641_s3] sm:$0xff] }
   0x4   :  { %79 = vmatpush.msra.mxu0 %v46_v1  ;;  %vm34_vm3 = vcmp.eq.s32.totalorder %v32_v5, %v410_v3  ;;  %v37_v7 = vld [vmem:[%s640_s2] sm:$0xff] }
   0x5   :  { %13 = vsyncpa [#allocation3], 0  ;;  %v469_v8 = vmov 0.0   ;;  %v42_v10 = vld [vmem:[%s641_s3 + $0x8] sm:$0xff]  ;;  %v43_v12 = vld [vmem:[%s641_s3 + $0x10] sm:$0xff]  ;;  %v470_v35 = vmov 0  }
   0x6   :  { %80 = vmatpush.msra.mxu0 %v45_v4  ;;  %v385_v9 = vsel %vm34_vm3, 1.0, %v469_v8  ;;  %v38_v11 = vld [vmem:[%s640_s2 + $0x8] sm:$0xff]  ;;  %v39_v13 = vld [vmem:[%s640_s2 + $0x10] sm:$0xff]  ;;  %v44_v14 = vld [vmem:[%s641_s3 + $0x18] sm:$0xff]  ;;  %408 = vset.pattern.permute.xlu1 %v470_v35  ;;  %vm224_vm13 = vcmask 261120   ;;  %s471_s22 = smov [#allocation2]  }
   0x7   :  { %391 = vmatpush.msk.msra.mxu1 %vm107_vm1, %v385_v9  ;;  %387 = vmatmul.msk.f32.vlgmr.msra.gmra.mxu0 %vm48_vm2, %v41_v6  ;;  %v40_v15 = vld [vmem:[%s640_s2 + $0x18] sm:$0xff]  ;;  %v201_v42 = vld [vmem:[%s643_s5 + $0x8] sm:$0xff]  ;;  %v200_v51 = vld [vmem:[%s643_s5] sm:$0xff]  ;;  %s371_s23 = sshll.u32 %s471_s22, 4  ;;  %s373_s26 = sshll.u32 %s646_s8, 4  ;;  %s372_s23 = int_to_ptr.vmem [resolvable:$true] %s371_s23  ;;  %s374_s26 = int_to_ptr.hbm [resolvable:$true] %s373_s26 }
   0x8   :  { %392 = vmatmul.msk.f32.vlgmr.msra.gmra.mxu1 %vm94_vm4, %v37_v7  ;;  %407 = vset.pattern.permute.xlu0 %v470_v35  ;;  %v203_v9 = vld [vmem:[%s643_s5 + $0x18] sm:$0xff]  ;;  %s472_s2 = smov 128  }
   0x9   :  { %409 = vset.pattern.permute.xlu2 %v470_v35  ;;  %211 = vperm.xlu1 %408, %v201_v42  }
   0xa   :  { %221 = vperm.xlu0 %407, %v203_v9  }
   0xf   :  { %388 = vmatmul.msk.f32.gmra.mxu0 %vm48_vm2, %v42_v10 }
  0x10   :  { %393 = vmatmul.msk.f32.gmra.mxu1 %vm94_vm4, %v38_v11 }
  0x11   :  { %206 = vperm.xlu1 %408, %v200_v51  }
  0x17   :  { %389 = vmatmul.msk.f32.gmra.mxu0 %vm48_vm2, %v43_v12 }
  0x18   :  { %394 = vmatmul.msk.f32.gmra.mxu1 %vm94_vm4, %v39_v13 }
  0x1f   :  { %390 = vmatmul.msk.f32.gmra.mxu0 %vm48_vm2, %v44_v14 }
  0x20   :  { %395 = vmatmul.msk.f32.gmra.mxu1 %vm94_vm4, %v40_v15  ;;  %v196_v15 = vld [vmem:[%s642_s4] sm:$0xff] }
  0x84   :  { %v82_v16 = vpop.f32.mrf.mxu0 }
  0x85   :  { %v128_v17 = vpop.f32.mrf.mxu1 }
  0x86   :  { %v565_v21 = vadd.f32 %v128_v17, %v82_v16  ;;  %v202_v17 = vld [vmem:[%s643_s5 + $0x10] sm:$0xff] }
  0x87   :  { %216 = vperm.xlu0 %407, %v202_v17  }
  0x88   :  { %v144_v26 = vmin.f32 %v565_v21, 20.0  ;;  %vm140_vm12 = vcmp.gt.f32.partialorder %v565_v21, 20.0 }
  0x8a   :  { %v148_v30 = vmul.f32 1.442695, %v144_v26 }
  0x8c   :  { %v85_v18 = vpop.f32.mrf.mxu0 }
  0x8d   :  { %v131_v19 = vpop.f32.mrf.mxu1 }
  0x8e   :  { %v563_v20 = vadd.f32 %v131_v19, %v85_v18  ;;  %v197_v18 = vld [vmem:[%s642_s4 + $0x8] sm:$0xff]  ;;  %v198_v19 = vld [vmem:[%s642_s4 + $0x10] sm:$0xff] }
  0x90   :  { %v145_v24 = vmin.f32 %v563_v20, 20.0  ;;  %vm141_vm11 = vcmp.gt.f32.partialorder %v563_v20, 20.0 }
  0x92   :  { %v150_v28 = vmul.f32 1.442695, %v145_v24 }
  0x94   :  { %v88_v22 = vpop.f32.mrf.mxu0 }
  0x95   :  { %v134_v23 = vpop.f32.mrf.mxu1 }
  0x96   :  { %v568_v25 = vadd.f32 %v134_v23, %v88_v22  ;;  %v212_v22 = vpop.permute.xlu1 %211  ;;  %v222_v23 = vpop.permute.xlu0 %221 }
  0x98   :  { %v146_v27 = vmin.f32 %v568_v25, 20.0  ;;  %vm142_vm9 = vcmp.gt.f32.partialorder %v568_v25, 20.0 }
  0x9a   :  { %v152_v29 = vmul.f32 1.442695, %v146_v27 }
  0x9c   :  { %411 = vpow2.f32 %v152_v29  ;;  %v91_v31 = vpop.f32.mrf.mxu0 }
  0x9d   :  { %v137_v32 = vpop.f32.mrf.mxu1  ;;  %413 = vpow2.f32 %v150_v28 }
  0x9e   :  { %v138_v33 = vadd.f32 %v137_v32, %v91_v31  ;;  %415 = vpow2.f32 %v148_v30 }
  0xa0   :  { %v147_v34 = vmin.f32 %v138_v33, 20.0  ;;  %vm143_vm7 = vcmp.gt.f32.partialorder %v138_v33, 20.0 }
  0xa2   :  { %v412_v36 = vpop.eup %411  ;;  %v154_v37 = vmul.f32 1.442695, %v147_v34 }
  0xa3   :  { %v414_v38 = vpop.eup %413  ;;  %v174_v40 = vadd.f32 1.0, %v412_v36  ;;  %v177_v47 = vmul.f32 -0.5, %v412_v36  ;;  %v180_v56 = vand.u32 2147483647, %v412_v36 }
  0xa4   :  { %417 = vpow2.f32 %v154_v37  ;;  %v416_v39 = vpop.eup %415  ;;  %v165_v41 = vadd.f32 1.0, %v414_v38  ;;  %v168_v48 = vmul.f32 -0.5, %v414_v38  ;;  %v171_v61 = vand.u32 2147483647, %v414_v38 }
  0xa5   :  { %v156_v43 = vadd.f32 1.0, %v416_v39  ;;  %419 = vlog2.f32 %v174_v40  ;;  %v159_v50 = vmul.f32 -0.5, %v416_v39  ;;  %v178_v53 = vadd.f32 1.0, %v177_v47 }
  0xa6   :  { %421 = vlog2.f32 %v165_v41  ;;  %v169_v59 = vadd.f32 1.0, %v168_v48  ;;  %v162_v63 = vand.u32 2147483647, %v416_v39  ;;  %vm181_vm6 = vcmp.lt.f32.partialorder %v180_v56, 0.0004427343 }
  0xa7   :  { %423 = vlog2.f32 %v156_v43  ;;  %v160_v62 = vadd.f32 1.0, %v159_v50  ;;  %v179_v2 = vmul.f32 %v412_v36, %v178_v53  ;;  %vm172_vm8 = vcmp.lt.f32.partialorder %v171_v61, 0.0004427343 }
  0xa8   :  { %v170_v7 = vmul.f32 %v414_v38, %v169_v59  ;;  %vm163_vm10 = vcmp.lt.f32.partialorder %v162_v63, 0.0004427343 }
  0xa9   :  { %v161_v11 = vmul.f32 %v416_v39, %v160_v62 }
  0xaa   :  { %v418_v44 = vpop.eup %417 }
  0xab   :  { %v183_v45 = vadd.f32 1.0, %v418_v44  ;;  %v186_v46 = vmul.f32 -0.5, %v418_v44  ;;  %v420_v49 = vpop.eup %419  ;;  %v189_v55 = vand.u32 2147483647, %v418_v44 }
  0xac   :  { %v422_v54 = vpop.eup %421  ;;  %v176_v58 = vmul.f32 0.6931472, %v420_v49 }
  0xad   :  { %425 = vlog2.f32 %v183_v45  ;;  %v187_v52 = vadd.f32 1.0, %v186_v46  ;;  %v424_v57 = vpop.eup %423  ;;  %v167_v3 = vmul.f32 0.6931472, %v422_v54  ;;  %vm190_vm5 = vcmp.lt.f32.partialorder %v189_v55, 0.0004427343  ;;  %v324_v46 = vld [vmem:[%s645_s7] sm:$0xff] }
  0xae   :  { %v158_v4 = vmul.f32 0.6931472, %v424_v57  ;;  %v182_v6 = vsel %vm181_vm6, %v179_v2, %v176_v58  ;;  %328 = vperm.xlu2 %409, %v324_v46  }
  0xaf   :  { %v188_v1 = vmul.f32 %v418_v44, %v187_v52  ;;  %v173_v10 = vsel %vm172_vm8, %v170_v7, %v167_v3  ;;  %v194_v12 = vsel %vm142_vm9, %v568_v25, %v182_v6  ;;  %v207_v25 = vpop.permute.xlu1 %206  ;;  %v325_v52 = vld [vmem:[%s645_s7 + $0x8] sm:$0xff] }
  0xb0   :  { %v164_v13 = vsel %vm163_vm10, %v161_v11, %v158_v4  ;;  %v193_v14 = vsel %vm141_vm11, %v563_v20, %v173_v10  ;;  %v199_v20 = vld [vmem:[%s642_s4 + $0x18] sm:$0xff] }
  0xb1   :  { %v192_v16 = vsel %vm140_vm12, %v565_v21, %v164_v13 }
  0xb3   :  { %v426_v60 = vpop.eup %425 }
  0xb4   :  { %v185_v0 = vmul.f32 0.6931472, %v426_v60 }
  0xb6   :  { %v191_v5 = vsel %vm190_vm5, %v188_v1, %v185_v0  ;;  %333 = vperm.xlu2 %409, %v325_v52  }
  0xb7   :  { %v195_v8 = vsel %vm143_vm7, %v138_v33, %v191_v5 }
  0xb8   :  { %249 = vmatpush.msra.mxu2 %v195_v8 }
  0xba   :  { %250 = vmatpush.msra.mxu2 %v194_v12 }
  0xbc   :  { %251 = vmatpush.msra.mxu2 %v193_v14 }
  0xbe   :  { %252 = vmatpush.msra.mxu2 %v192_v16 }
  0xbf   :  { %396 = vmatmul.msk.f32.vlgmr.msra.gmra.mxu2 %vm224_vm13, %v196_v15 }
  0xc7   :  { %397 = vmatmul.msk.f32.gmra.mxu2 %vm224_vm13, %v197_v18  ;;  %v322_v18 = vld [vmem:[%s644_s6] sm:$0xff] }
  0xcf   :  { %398 = vmatmul.msk.f32.gmra.mxu2 %vm224_vm13, %v198_v19 }
  0xd7   :  { %399 = vmatmul.msk.f32.gmra.mxu2 %vm224_vm13, %v199_v20  ;;  %v323_v20 = vld [vmem:[%s644_s6 + $0x8] sm:$0xff]  ;;  %s473_s6 = smov 8  }
  0xf9   :  { %v217_v28 = vpop.permute.xlu0 %216 }
 0x142   :  { %v254_v21 = vpop.f32.mrf.mxu2 }
 0x143   :  { %v608_v27 = vadd.f32 %v254_v21, %v207_v25  ;;  %v329_v21 = vpop.permute.xlu2 %328 }
 0x145   :  { %v270_v32 = vmin.f32 %v608_v27, 20.0  ;;  %vm266_vm5 = vcmp.gt.f32.partialorder %v608_v27, 20.0 }
 0x147   :  { %v274_v36 = vmul.f32 1.442695, %v270_v32 }
 0x14a   :  { %v257_v24 = vpop.f32.mrf.mxu2 }
 0x14b   :  { %v606_v26 = vadd.f32 %v257_v24, %v212_v22  ;;  %v334_v24 = vpop.permute.xlu2 %333 }
 0x14d   :  { %v271_v30 = vmin.f32 %v606_v26, 20.0  ;;  %vm267_vm4 = vcmp.gt.f32.partialorder %v606_v26, 20.0 }
 0x14f   :  { %v276_v34 = vmul.f32 1.442695, %v271_v30 }
 0x152   :  { %v260_v29 = vpop.f32.mrf.mxu2 }
 0x153   :  { %v611_v31 = vadd.f32 %v260_v29, %v217_v28 }
 0x155   :  { %v272_v33 = vmin.f32 %v611_v31, 20.0  ;;  %vm268_vm2 = vcmp.gt.f32.partialorder %v611_v31, 20.0 }
 0x157   :  { %v278_v35 = vmul.f32 1.442695, %v272_v33 }
 0x159   :  { %427 = vpow2.f32 %v278_v35 }
 0x15a   :  { %v263_v37 = vpop.f32.mrf.mxu2  ;;  %429 = vpow2.f32 %v276_v34 }
 0x15b   :  { %v264_v38 = vadd.f32 %v263_v37, %v222_v23  ;;  %431 = vpow2.f32 %v274_v36 }
 0x15d   :  { %v273_v39 = vmin.f32 %v264_v38, 20.0  ;;  %vm269_vm0 = vcmp.gt.f32.partialorder %v264_v38, 20.0 }
 0x15f   :  { %v428_v40 = vpop.eup %427  ;;  %v280_v41 = vmul.f32 1.442695, %v273_v39 }
 0x160   :  { %v430_v42 = vpop.eup %429  ;;  %v300_v44 = vadd.f32 1.0, %v428_v40  ;;  %v303_v51 = vmul.f32 -0.5, %v428_v40  ;;  %v306_v60 = vand.u32 2147483647, %v428_v40 }
 0x161   :  { %433 = vpow2.f32 %v280_v41  ;;  %v432_v43 = vpop.eup %431  ;;  %v291_v45 = vadd.f32 1.0, %v430_v42  ;;  %v294_v53 = vmul.f32 -0.5, %v430_v42  ;;  %v297_v1 = vand.u32 2147483647, %v430_v42 }
 0x162   :  { %v282_v47 = vadd.f32 1.0, %v432_v43  ;;  %435 = vlog2.f32 %v300_v44  ;;  %v285_v55 = vmul.f32 -0.5, %v432_v43  ;;  %v304_v57 = vadd.f32 1.0, %v303_v51 }
 0x163   :  { %437 = vlog2.f32 %v291_v45  ;;  %v295_v63 = vadd.f32 1.0, %v294_v53  ;;  %v288_v3 = vand.u32 2147483647, %v432_v43  ;;  %vm307_vm15 = vcmp.lt.f32.partialorder %v306_v60, 0.0004427343 }
 0x164   :  { %439 = vlog2.f32 %v282_v47  ;;  %v286_v2 = vadd.f32 1.0, %v285_v55  ;;  %v305_v6 = vmul.f32 %v428_v40, %v304_v57  ;;  %vm298_vm1 = vcmp.lt.f32.partialorder %v297_v1, 0.0004427343 }
 0x165   :  { %v296_v11 = vmul.f32 %v430_v42, %v295_v63  ;;  %vm289_vm3 = vcmp.lt.f32.partialorder %v288_v3, 0.0004427343 }
 0x166   :  { %v287_v14 = vmul.f32 %v432_v43, %v286_v2 }
 0x167   :  { %v434_v48 = vpop.eup %433 }
 0x168   :  { %v309_v49 = vadd.f32 1.0, %v434_v48  ;;  %v312_v50 = vmul.f32 -0.5, %v434_v48  ;;  %v436_v54 = vpop.eup %435  ;;  %v315_v59 = vand.u32 2147483647, %v434_v48 }
 0x169   :  { %v438_v58 = vpop.eup %437  ;;  %v302_v62 = vmul.f32 0.6931472, %v436_v54 }
 0x16a   :  { %441 = vlog2.f32 %v309_v49  ;;  %v313_v56 = vadd.f32 1.0, %v312_v50  ;;  %v440_v61 = vpop.eup %439  ;;  %v293_v7 = vmul.f32 0.6931472, %v438_v58  ;;  %vm316_vm14 = vcmp.lt.f32.partialorder %v315_v59, 0.0004427343 }
 0x16b   :  { %v284_v8 = vmul.f32 0.6931472, %v440_v61  ;;  %v308_v10 = vsel %vm307_vm15, %v305_v6, %v302_v62 }
 0x16c   :  { %v314_v5 = vmul.f32 %v434_v48, %v313_v56  ;;  %v299_v13 = vsel %vm298_vm1, %v296_v11, %v293_v7  ;;  %v320_v15 = vsel %vm268_vm2, %v611_v31, %v308_v10 }
 0x16d   :  { %v290_v16 = vsel %vm289_vm3, %v287_v14, %v284_v8  ;;  %v319_v17 = vsel %vm267_vm4, %v606_v26, %v299_v13 }
 0x16e   :  { %v318_v19 = vsel %vm266_vm5, %v608_v27, %v290_v16 }
 0x170   :  { %v442_v0 = vpop.eup %441 }
 0x171   :  { %v311_v4 = vmul.f32 0.6931472, %v442_v0 }
 0x173   :  { %v317_v9 = vsel %vm316_vm14, %v314_v5, %v311_v4 }
 0x174   :  { %v321_v12 = vsel %vm269_vm0, %v264_v38, %v317_v9 }
 0x175   :  { %354 = vmatpush.msra.mxu3 %v321_v12 }
 0x177   :  { %355 = vmatpush.msra.mxu3 %v320_v15 }
 0x179   :  { %356 = vmatpush.msra.mxu3 %v319_v17 }
 0x17b   :  { %357 = vmatpush.msra.mxu3 %v318_v19 }
 0x17c   :  { %400 = vmatmul.msk.f32.vlgmr.msra.gmra.mxu3 %vm224_vm13, %v322_v18 }
 0x184   :  { %401 = vmatmul.msk.f32.gmra.mxu3 %vm224_vm13, %v323_v20 }
 0x1ff   :  { %v359_v22 = vpop.f32.mrf.mxu3 }
 0x200   :  { %v360_v23 = vadd.f32 %v359_v22, %v329_v21 }
 0x202   :  { %365 = vst [vmem:[#allocation2] sm:$0xff] %v360_v23 }
 0x207   :  { %v362_v25 = vpop.f32.mrf.mxu3 }
 0x208   :  { %v363_v26 = vadd.f32 %v362_v25, %v334_v24 }
 0x20a   :  { %366 = vst [vmem:[#allocation2 + $0x8] sm:$0xff] %v363_v26 }
 0x20b   :  { %379 = dma.vmem_to_hbm [thread:$0]  %s372_s23, 256, %s374_s26, [#allocation3], %s472_s2, %s472_s2, %s473_s6  }
 0x20c   :  { %467 = dma.done.wait [#allocation3], 256  }
 0x20d   :  { %468 = vsyncadd [#allocation3], 4294967040 }
 0x20e   :  { %384 = vsyncpa [#allocation3], 1 }

</bundles_post_ra>
